<compile_context>
chip_gen: v7x
topology: tpu7x:2x2x1
jax: 0.10.0
libtpu: 0.0.40
codegen_flags: <defaults>
</compile_context>

<pallas_src>
import jax
import jax.numpy as jnp
import numpy as np
from jax.experimental import pallas as pl
from jax.experimental.pallas import tpu as pltpu


def _offsets(Lout, NC):
    """Row offsets inside the packed constants slab (8-aligned where it matters)."""
    up8 = lambda v: ((v + 7) // 8) * 8
    off_s = 0                      # stride-2 selector S        (Lout rows)
    off_par = up8(Lout)            # 6 single-row param vectors
    off_w1 = off_par + 8           # fused conv1 weights        (3*NC rows)
    off_w2 = off_w1 + 3 * NC       # fused conv2 weights        (3*NC rows)
    off_f = off_w2 + 3 * NC        # n-group fold matrix        (NC rows)
    total = up8(off_f + NC)
    return off_s, off_par, off_w1, off_w2, off_f, total


def _make_kernel(N, C, L):
    Lout = (L - 2) // 2 + 1
    NC = N * C
    off_s, off_par, off_w1, off_w2, off_f, _ = _offsets(Lout, NC)
    inv_cnt = 1.0 / float(N * Lout)
    eps = 1e-5

    def kernel(x_ref, cst_ref, o_ref):
        # ---- constants: static slices of the single packed slab (one DMA) ----
        S = cst_ref[off_s:off_s + Lout, 0:L - 1]           # (Lout, L-1) stride-2 selector
        F = cst_ref[off_f:off_f + NC, 0:NC]                # (NC, NC) n-group fold matrix
        W1 = cst_ref[off_w1:off_w1 + 3 * NC, 0:NC]         # fused conv1 weights (3NC, NC)
        W2 = cst_ref[off_w2:off_w2 + 3 * NC, 0:NC]         # fused conv2 weights (3NC, NC)
        g1 = cst_ref[off_par + 0:off_par + 1, 0:NC]        # BN1 gamma  (1, NC)
        be1 = cst_ref[off_par + 1:off_par + 2, 0:NC]       # BN1 beta
        cb1 = cst_ref[off_par + 2:off_par + 3, 0:NC]       # conv1 bias
        g2 = cst_ref[off_par + 3:off_par + 4, 0:NC]        # BN2 gamma
        be2 = cst_ref[off_par + 4:off_par + 5, 0:NC]       # BN2 beta
        cb2 = cst_ref[off_par + 5:off_par + 6, 0:NC]       # conv2 bias

        # ---- shortcut: ConstantPad1d((0,1),0) + MaxPool1d(3,2), whole batch at once ----
        # One 2-D transpose -> (L, N*C) layout (rows = position, lanes = (n, c)).
        xt = x_ref[...].reshape(NC, L).T                                   # (L, NC)
        xp = jnp.concatenate([xt, jnp.zeros((1, NC), jnp.float32)], axis=0)
        w3 = jnp.maximum(jnp.maximum(xp[0:L - 1, :], xp[1:L, :]), xp[2:L + 1, :])
        sc = jnp.dot(S, w3, preferred_element_type=jnp.float32)            # (Lout, NC)

        def bn_relu(h, gamma, beta):
            # Training-mode BatchNorm1d: per-channel stats over (N, Lout), biased var,
            # centered two-pass variance.  h @ F sums the N batch lane-groups per channel
            # (result replicated across groups), so the row-sum of (h @ F) is the
            # per-channel sum already laid out for a direct broadcast apply.
            mean = jnp.sum(jnp.dot(h, F, preferred_element_type=jnp.float32),
                           axis=0, keepdims=True) * inv_cnt
            d = h - mean
            var = jnp.sum(jnp.dot(d * d, F, preferred_element_type=jnp.float32),
                          axis=0, keepdims=True) * inv_cnt
            scale = gamma * jax.lax.rsqrt(var + eps)
            return jnp.maximum(d * scale + beta, 0.0)

        def conv3(h, w_fused, bias):
            # Conv1d(C->C, k=3, padding=1) as ONE fused matmul over the 3 taps.
            # Rows are the shared sequence axis for all batches, so one zero boundary
            # row pads every batch simultaneously.
            zrow = jnp.zeros((1, NC), jnp.float32)
            h_prev = jnp.concatenate([zrow, h[0:Lout - 1, :]], axis=0)     # x[j-1]
            h_next = jnp.concatenate([h[1:Lout, :], zrow], axis=0)        # x[j+1]
            h3 = jnp.concatenate([h_prev, h, h_next], axis=1)             # (Lout, 3NC)
            return jnp.dot(h3, w_fused, preferred_element_type=jnp.float32) + bias

        h = bn_relu(sc, g1, be1)
        h = conv3(h, W1, cb1)
        h = bn_relu(h, g2, be2)
        h = conv3(h, W2, cb2)
        o_ref[...] = (h + sc).astype(o_ref.dtype)                          # lane-dense store

    return kernel


def prepare_params(params, N, C, L):
    """One-time parameter prep (hoist out of any hot loop): pack everything the kernel
    needs besides x into a single f32 slab -> one input DMA instead of eight."""
    g1, be1, w1, cb1, g2, be2, w2, cb2 = params
    Lout = (L - 2) // 2 + 1
    NC = N * C
    width = max(NC, L - 1)
    off_s, off_par, off_w1, off_w2, off_f, total = _offsets(Lout, NC)
    packed = np.zeros((total, width), np.float32)

    # Stride-2 window-start selector S[j, p] = 1 iff p == 2*j (hoisted out of the kernel).
    jj = np.arange(Lout)[:, None]
    pp = np.arange(L - 1)[None, :]
    packed[off_s:off_s + Lout, 0:L - 1] = (pp == 2 * jj).astype(np.float32)

    # Per-channel vectors tiled across the N batch lane-groups (lane index = n*C + c).
    for r, v in enumerate((g1, be1, cb1, g2, be2, cb2)):
        packed[off_par + r, 0:NC] = np.tile(np.asarray(v, np.float32), N)

    # Fused 3-tap conv weights: torch (Cout, Cin, 3) -> (3*NC, NC), block-diagonal over
    # the batch lane-groups; tap k multiplies x[j + k - 1].
    eye_n = np.eye(N, dtype=np.float32)

    def fuse(w):
        w = np.asarray(w, np.float32)
        taps = [np.kron(eye_n, w[:, :, k].T) for k in range(3)]            # (NC, NC) each
        return np.concatenate(taps, axis=0)

    packed[off_w1:off_w1 + 3 * NC, 0:NC] = fuse(w1)
    packed[off_w2:off_w2 + 3 * NC, 0:NC] = fuse(w2)

    # n-group fold matrix: F[(n,c), (n',c')] = 1 iff c == c'.
    packed[off_f:off_f + NC, 0:NC] = np.kron(np.ones((N, N), np.float32),
                                             np.eye(C, dtype=np.float32))
    return jnp.asarray(packed)


def resnet_block(x_ncl, packed):
    """x_ncl: (N, C, L) float32 (PyTorch NCL).  packed: from prepare_params.
    Returns (N, C, Lout) float32."""
    N, C, L = x_ncl.shape
    Lout = (L - 2) // 2 + 1
    NC = N * C

    # All-resident single-grid-step design.  Stays KB-scale here; re-derive tiling
    # (row-tiled grid + 3-phase BN stats/apply) before scaling C/L -- v7x has only
    # 64 MiB physical VMEM per TensorCore.
    footprint = 4 * (int(np.prod(x_ncl.shape)) + int(np.prod(packed.shape)) + 16 * Lout * NC)
    assert footprint < (1 << 20), "shapes too large for the all-resident design"

    out = pl.pallas_call(
        _make_kernel(N, C, L),
        out_shape=jax.ShapeDtypeStruct((Lout, NC), jnp.float32),          # lane-dense slab
        in_specs=[pl.BlockSpec(memory_space=pltpu.MemorySpace.VMEM)] * 2,
        out_specs=pl.BlockSpec(memory_space=pltpu.MemorySpace.VMEM),
        compiler_params=pltpu.CompilerParams(vmem_limit_bytes=2 * 1024 * 1024),
    )(x_ncl, packed)

    # NCL view for the PyTorch-layout consumer (plain XLA, outside the kernel).
    return out.reshape(Lout, N, C).transpose(1, 2, 0)


def init_params(key, C):
    ks = jax.random.split(key, 8)
    g1 = 1.0 + 0.1 * jax.random.normal(ks[0], (C,), jnp.float32)
    be1 = 0.1 * jax.random.normal(ks[1], (C,), jnp.float32)
    w1 = 0.2 * jax.random.normal(ks[2], (C, C, 3), jnp.float32)   # (Cout, Cin, K)
    cb1 = 0.1 * jax.random.normal(ks[3], (C,), jnp.float32)
    g2 = 1.0 + 0.1 * jax.random.normal(ks[4], (C,), jnp.float32)
    be2 = 0.1 * jax.random.normal(ks[5], (C,), jnp.float32)
    w2 = 0.2 * jax.random.normal(ks[6], (C, C, 3), jnp.float32)
    cb2 = 0.1 * jax.random.normal(ks[7], (C,), jnp.float32)
    return (g1, be1, w1, cb1, g2, be2, w2, cb2)


def ref_forward(x_ncl, params):
    """Independent pure-JAX reference in PyTorch NCL layout."""
    g1, be1, w1, cb1, g2, be2, w2, cb2 = params
    eps = 1e-5

    xp = jnp.pad(x_ncl, ((0, 0), (0, 0), (0, 1)))             # ConstantPad1d((0,1), 0)
    sc = jax.lax.reduce_window(xp, -jnp.inf, jax.lax.max,
                               (1, 1, 3), (1, 1, 2), 'VALID')  # MaxPool1d(3, 2)

    def bn_relu(h, g, b):
        mean = h.mean(axis=(0, 2), keepdims=True)
        var = ((h - mean) ** 2).mean(axis=(0, 2), keepdims=True)
        hn = (h - mean) / jnp.sqrt(var + eps)
        return jax.nn.relu(hn * g[None, :, None] + b[None, :, None])

    def conv(h, w, b):
        y = jax.lax.conv_general_dilated(h, w, window_strides=(1,), padding=((1, 1),),
                                         dimension_numbers=('NCH', 'OIH', 'NCH'))
        return y + b[None, :, None]

    h = bn_relu(sc, g1, be1)
    h = conv(h, w1, cb1)
    h = bn_relu(h, g2, be2)
    h = conv(h, w2, cb2)
    return h + sc


if __name__ == "__main__":
    key = jax.random.PRNGKey(0)
    kx, kp = jax.random.split(key)

    N, C, L = 2, 8, 16                       # channel_size = 8
    x = jax.random.normal(kx, (N, C, L), jnp.float32)
    params = init_params(kp, C)

    packed = prepare_params(params, N, C, L)                  # one-time prep
    out = jax.block_until_ready(resnet_block(x, packed))      # (2, 8, 8)

    ref = jax.block_until_ready(ref_forward(x, params))
    np.testing.assert_allclose(np.asarray(out), np.asarray(ref), rtol=1e-4, atol=1e-4)

    print("KERNEL_OK")
</pallas_src>

<mosaic_0001>
module attributes {stable_mosaic.version = 11 : i64} {
  func.func @kernel(%arg0: memref<2x8x16xf32, #tpu.memory_space<vmem>>, %arg1: memref<128x16xf32, #tpu.memory_space<vmem>>, %arg2: memref<8x16xf32, #tpu.memory_space<vmem>>) attributes {dimension_semantics = [], scalar_prefetch = 0 : i64, scratch_operands = 0 : i64, tpu.core_type = #tpu.core_type<tc>} {
    %c0 = arith.constant 0 : index
    %c0_0 = arith.constant 0 : index
    %0 = vector.load %arg1[%c0, %c0_0] : memref<128x16xf32, #tpu.memory_space<vmem>>, vector<8x15xf32>
    %c112 = arith.constant 112 : index
    %c0_1 = arith.constant 0 : index
    %1 = vector.load %arg1[%c112, %c0_1] : memref<128x16xf32, #tpu.memory_space<vmem>>, vector<16x16xf32>
    %c16 = arith.constant 16 : index
    %c0_2 = arith.constant 0 : index
    %2 = vector.load %arg1[%c16, %c0_2] : memref<128x16xf32, #tpu.memory_space<vmem>>, vector<48x16xf32>
    %c64 = arith.constant 64 : index
    %c0_3 = arith.constant 0 : index
    %3 = vector.load %arg1[%c64, %c0_3] : memref<128x16xf32, #tpu.memory_space<vmem>>, vector<48x16xf32>
    %c8 = arith.constant 8 : index
    %c0_4 = arith.constant 0 : index
    %4 = vector.load %arg1[%c8, %c0_4] : memref<128x16xf32, #tpu.memory_space<vmem>>, vector<1x16xf32>
    %c9 = arith.constant 9 : index
    %c0_5 = arith.constant 0 : index
    %5 = vector.load %arg1[%c9, %c0_5] : memref<128x16xf32, #tpu.memory_space<vmem>>, vector<1x16xf32>
    %c10 = arith.constant 10 : index
    %c0_6 = arith.constant 0 : index
    %6 = vector.load %arg1[%c10, %c0_6] : memref<128x16xf32, #tpu.memory_space<vmem>>, vector<1x16xf32>
    %c11 = arith.constant 11 : index
    %c0_7 = arith.constant 0 : index
    %7 = vector.load %arg1[%c11, %c0_7] : memref<128x16xf32, #tpu.memory_space<vmem>>, vector<1x16xf32>
    %c12 = arith.constant 12 : index
    %c0_8 = arith.constant 0 : index
    %8 = vector.load %arg1[%c12, %c0_8] : memref<128x16xf32, #tpu.memory_space<vmem>>, vector<1x16xf32>
    %c13 = arith.constant 13 : index
    %c0_9 = arith.constant 0 : index
    %9 = vector.load %arg1[%c13, %c0_9] : memref<128x16xf32, #tpu.memory_space<vmem>>, vector<1x16xf32>
    %c0_10 = arith.constant 0 : index
    %c0_11 = arith.constant 0 : index
    %c0_12 = arith.constant 0 : index
    %10 = vector.load %arg0[%c0_10, %c0_11, %c0_12] : memref<2x8x16xf32, #tpu.memory_space<vmem>>, vector<2x8x16xf32>
    %11 = vector.shape_cast %10 : vector<2x8x16xf32> to vector<16x16xf32>
    %12 = tpu.transpose %11, [1, 0] : vector<16x16xf32> -> vector<16x16xf32>
    %cst = arith.constant 0.000000e+00 : f32
    %13 = vector.broadcast %cst : f32 to vector<1x16xf32>
    %14 = tpu.concatenate %12, %13 in 0 : vector<16x16xf32>, vector<1x16xf32> -> vector<17x16xf32>
    %15 = vector.extract_strided_slice %14 {offsets = [0, 0], sizes = [15, 16], strides = [1, 1]} : vector<17x16xf32> to vector<15x16xf32>
    %16 = vector.extract_strided_slice %14 {offsets = [1, 0], sizes = [15, 16], strides = [1, 1]} : vector<17x16xf32> to vector<15x16xf32>
    %17 = arith.maximumf %15, %16 : vector<15x16xf32>
    %18 = vector.extract_strided_slice %14 {offsets = [2, 0], sizes = [15, 16], strides = [1, 1]} : vector<17x16xf32> to vector<15x16xf32>
    %19 = arith.maximumf %17, %18 : vector<15x16xf32>
    %cst_13 = arith.constant dense<0.000000e+00> : vector<8x16xf32>
    %20 = tpu.matmul %0, %19, %cst_13 {dimension_numbers = #tpu.dot_dimension_numbers<[1], [0], [0], [1], [0, 0, 1, 1], [], []>} : vector<8x15xf32>, vector<15x16xf32>, vector<8x16xf32> -> vector<8x16xf32>
    %cst_14 = arith.constant dense<0.000000e+00> : vector<8x16xf32>
    %21 = tpu.matmul %20, %1, %cst_14 {dimension_numbers = #tpu.dot_dimension_numbers<[1], [0], [0], [1], [0, 0, 1, 1], [], []>} : vector<8x16xf32>, vector<16x16xf32>, vector<8x16xf32> -> vector<8x16xf32>
    %cst_15 = arith.constant dense<0.000000e+00> : vector<16xf32>
    %22 = vector.multi_reduction <add>, %21, %cst_15 [0] : vector<8x16xf32> to vector<16xf32>
    %23 = vector.shape_cast %22 : vector<16xf32> to vector<1x16xf32>
    %cst_16 = arith.constant 6.250000e-02 : f32
    %24 = vector.broadcast %cst_16 : f32 to vector<1x16xf32>
    %25 = arith.mulf %23, %24 : vector<1x16xf32>
    %26 = vector.broadcast %25 : vector<1x16xf32> to vector<8x16xf32>
    %27 = arith.subf %20, %26 : vector<8x16xf32>
    %28 = arith.mulf %27, %27 : vector<8x16xf32>
    %cst_17 = arith.constant dense<0.000000e+00> : vector<8x16xf32>
    %29 = tpu.matmul %28, %1, %cst_17 {dimension_numbers = #tpu.dot_dimension_numbers<[1], [0], [0], [1], [0, 0, 1, 1], [], []>} : vector<8x16xf32>, vector<16x16xf32>, vector<8x16xf32> -> vector<8x16xf32>
    %cst_18 = arith.constant dense<0.000000e+00> : vector<16xf32>
    %30 = vector.multi_reduction <add>, %29, %cst_18 [0] : vector<8x16xf32> to vector<16xf32>
    %31 = vector.shape_cast %30 : vector<16xf32> to vector<1x16xf32>
    %cst_19 = arith.constant 6.250000e-02 : f32
    %32 = vector.broadcast %cst_19 : f32 to vector<1x16xf32>
    %33 = arith.mulf %31, %32 : vector<1x16xf32>
    %cst_20 = arith.constant 9.99999974E-6 : f32
    %34 = vector.broadcast %cst_20 : f32 to vector<1x16xf32>
    %35 = arith.addf %33, %34 : vector<1x16xf32>
    %36 = math.rsqrt %35 : vector<1x16xf32>
    %37 = arith.mulf %4, %36 : vector<1x16xf32>
    %38 = vector.broadcast %37 : vector<1x16xf32> to vector<8x16xf32>
    %39 = arith.mulf %27, %38 : vector<8x16xf32>
    %40 = vector.broadcast %5 : vector<1x16xf32> to vector<8x16xf32>
    %41 = arith.addf %39, %40 : vector<8x16xf32>
    %cst_21 = arith.constant 0.000000e+00 : f32
    %42 = vector.broadcast %cst_21 : f32 to vector<8x16xf32>
    %43 = arith.maximumf %41, %42 : vector<8x16xf32>
    %cst_22 = arith.constant 0.000000e+00 : f32
    %44 = vector.broadcast %cst_22 : f32 to vector<1x16xf32>
    %45 = vector.extract_strided_slice %43 {offsets = [0, 0], sizes = [7, 16], strides = [1, 1]} : vector<8x16xf32> to vector<7x16xf32>
    %46 = tpu.concatenate %44, %45 in 0 : vector<1x16xf32>, vector<7x16xf32> -> vector<8x16xf32>
    %47 = vector.extract_strided_slice %43 {offsets = [1, 0], sizes = [7, 16], strides = [1, 1]} : vector<8x16xf32> to vector<7x16xf32>
    %48 = tpu.concatenate %47, %44 in 0 : vector<7x16xf32>, vector<1x16xf32> -> vector<8x16xf32>
    %49 = tpu.concatenate %46, %43, %48 in 1 : vector<8x16xf32>, vector<8x16xf32>, vector<8x16xf32> -> vector<8x48xf32>
    %cst_23 = arith.constant dense<0.000000e+00> : vector<8x16xf32>
    %50 = tpu.matmul %49, %2, %cst_23 {dimension_numbers = #tpu.dot_dimension_numbers<[1], [0], [0], [1], [0, 0, 1, 1], [], []>} : vector<8x48xf32>, vector<48x16xf32>, vector<8x16xf32> -> vector<8x16xf32>
    %51 = vector.broadcast %6 : vector<1x16xf32> to vector<8x16xf32>
    %52 = arith.addf %50, %51 : vector<8x16xf32>
    %cst_24 = arith.constant dense<0.000000e+00> : vector<8x16xf32>
    %53 = tpu.matmul %52, %1, %cst_24 {dimension_numbers = #tpu.dot_dimension_numbers<[1], [0], [0], [1], [0, 0, 1, 1], [], []>} : vector<8x16xf32>, vector<16x16xf32>, vector<8x16xf32> -> vector<8x16xf32>
    %cst_25 = arith.constant dense<0.000000e+00> : vector<16xf32>
    %54 = vector.multi_reduction <add>, %53, %cst_25 [0] : vector<8x16xf32> to vector<16xf32>
    %55 = vector.shape_cast %54 : vector<16xf32> to vector<1x16xf32>
    %cst_26 = arith.constant 6.250000e-02 : f32
    %56 = vector.broadcast %cst_26 : f32 to vector<1x16xf32>
    %57 = arith.mulf %55, %56 : vector<1x16xf32>
    %58 = vector.broadcast %57 : vector<1x16xf32> to vector<8x16xf32>
    %59 = arith.subf %52, %58 : vector<8x16xf32>
    %60 = arith.mulf %59, %59 : vector<8x16xf32>
    %cst_27 = arith.constant dense<0.000000e+00> : vector<8x16xf32>
    %61 = tpu.matmul %60, %1, %cst_27 {dimension_numbers = #tpu.dot_dimension_numbers<[1], [0], [0], [1], [0, 0, 1, 1], [], []>} : vector<8x16xf32>, vector<16x16xf32>, vector<8x16xf32> -> vector<8x16xf32>
    %cst_28 = arith.constant dense<0.000000e+00> : vector<16xf32>
    %62 = vector.multi_reduction <add>, %61, %cst_28 [0] : vector<8x16xf32> to vector<16xf32>
    %63 = vector.shape_cast %62 : vector<16xf32> to vector<1x16xf32>
    %cst_29 = arith.constant 6.250000e-02 : f32
    %64 = vector.broadcast %cst_29 : f32 to vector<1x16xf32>
    %65 = arith.mulf %63, %64 : vector<1x16xf32>
    %cst_30 = arith.constant 9.99999974E-6 : f32
    %66 = vector.broadcast %cst_30 : f32 to vector<1x16xf32>
    %67 = arith.addf %65, %66 : vector<1x16xf32>
    %68 = math.rsqrt %67 : vector<1x16xf32>
    %69 = arith.mulf %7, %68 : vector<1x16xf32>
    %70 = vector.broadcast %69 : vector<1x16xf32> to vector<8x16xf32>
    %71 = arith.mulf %59, %70 : vector<8x16xf32>
    %72 = vector.broadcast %8 : vector<1x16xf32> to vector<8x16xf32>
    %73 = arith.addf %71, %72 : vector<8x16xf32>
    %cst_31 = arith.constant 0.000000e+00 : f32
    %74 = vector.broadcast %cst_31 : f32 to vector<8x16xf32>
    %75 = arith.maximumf %73, %74 : vector<8x16xf32>
    %cst_32 = arith.constant 0.000000e+00 : f32
    %76 = vector.broadcast %cst_32 : f32 to vector<1x16xf32>
    %77 = vector.extract_strided_slice %75 {offsets = [0, 0], sizes = [7, 16], strides = [1, 1]} : vector<8x16xf32> to vector<7x16xf32>
    %78 = tpu.concatenate %76, %77 in 0 : vector<1x16xf32>, vector<7x16xf32> -> vector<8x16xf32>
    %79 = vector.extract_strided_slice %75 {offsets = [1, 0], sizes = [7, 16], strides = [1, 1]} : vector<8x16xf32> to vector<7x16xf32>
    %80 = tpu.concatenate %79, %76 in 0 : vector<7x16xf32>, vector<1x16xf32> -> vector<8x16xf32>
    %81 = tpu.concatenate %78, %75, %80 in 1 : vector<8x16xf32>, vector<8x16xf32>, vector<8x16xf32> -> vector<8x48xf32>
    %cst_33 = arith.constant dense<0.000000e+00> : vector<8x16xf32>
    %82 = tpu.matmul %81, %3, %cst_33 {dimension_numbers = #tpu.dot_dimension_numbers<[1], [0], [0], [1], [0, 0, 1, 1], [], []>} : vector<8x48xf32>, vector<48x16xf32>, vector<8x16xf32> -> vector<8x16xf32>
    %83 = vector.broadcast %9 : vector<1x16xf32> to vector<8x16xf32>
    %84 = arith.addf %82, %83 : vector<8x16xf32>
    %85 = arith.addf %84, %20 : vector<8x16xf32>
    %c0_34 = arith.constant 0 : index
    %c0_35 = arith.constant 0 : index
    %86 = vector.load %arg2[%c0_34, %c0_35] : memref<8x16xf32, #tpu.memory_space<vmem>>, vector<8x16xf32>
    tpu.vector_store %arg2[%c0_34, %c0_35], %85 {strides = array<i32>} : memref<8x16xf32, #tpu.memory_space<vmem>>, vector<8x16xf32>,
    return
  }
}

</mosaic_0001>

<bundles_post_ra>
// kernel: tpu_custom_call.1
= control target key start
LH: loop header
LB: loop body
LE: loop exit
PB: predicated region body
PF: predicated region fallthrough
CT: control target
= control target key end

     0   :  { %s1074_s0 = inlined_call_operand.vmem [shape: f32[2,8,16], index: 0, kind: input, shape index: {}]   ;;  %s1075_s1 = inlined_call_operand.vmem [shape: f32[128,16], index: 1, kind: input, shape index: {}]   ;;  %s1076_s2 = inlined_call_operand.hbm [shape: f32[8,16], index: 2, kind: output, shape index: {}]  }
   0x1   :  { %v33_v0 = vld [vmem:[%s1074_s0] sm:$0xff] }
   0x2   :  { %7 = vsyncpa [#allocation3], 0  ;;  %35 = vxpose.xlu0.b32.start [1/2] (short) (narrow) %v33_v0, 16  ;;  %v34_v1 = vld [vmem:[%s1074_s0 + $0x8] sm:$0xff]  ;;  %v902_v2 = vmov 0.0|0.0   ;;  %vm903_vm0 = vmmov 0   ;;  %v333_v54 = vlaneseq }
   0x3   :  { %833 = vmatprep.subr.bf16.mxu1 %v902_v2  ;;  %840 = vmatprep.subr.bf16.mxu0 %v902_v2  ;;  %v904_v3 = vmov 0.0   ;;  %v13_v4 = vld [vmem:[%s1075_s1 + $0x70] sm:$0xff]  ;;  %v14_v5 = vld [vmem:[%s1075_s1 + $0x78] sm:$0xff]  ;;  %vm78_vm1 = vcmask 1045504   ;;  %vm69_vm2 = vcmask 1046528   ;;  %vm905_vm3 = vmmov 1  }
   0x4   :  { %772 = vmatprep.mubr.msk.f32.mxu1 %vm903_vm0, %v904_v3  ;;  %786 = vmatprep.mubr.msk.f32.mxu0 %vm903_vm0, %v904_v3  ;;  %v942_v6 = vpack.c.bf16 %v14_v5, %v13_v4  ;;  %v82_v8 = vrot.slane %v904_v3, 2  ;;  %vm835_vm4 = vmpackc.low %vm69_vm2, %vm905_vm3  ;;  %v12_v22 = vld [vmem:[%s1075_s1] sm:$0xff]  ;;  %vm88_vm5 = vcmask 121856   ;;  %vm165_vm6 = vcmask 130048   ;;  %v15_v37 = vld [vmem:[%s1075_s1 + $0x10] sm:$0xff]  ;;  %s906_s6 = smov 16  }
   0x5   :  { %v16_v38 = vld [vmem:[%s1075_s1 + $0x18] sm:$0xff]  ;;  %v17_v39 = vld [vmem:[%s1075_s1 + $0x20] sm:$0xff]  ;;  %v18_v41 = vld [vmem:[%s1075_s1 + $0x28] sm:$0xff]  ;;  %v985_v55 = vshrl.u32 %v333_v54, 7  ;;  %s907_s7 = smov 32   ;;  %vm347_vm7 = vcmask 1040384  }
   0x6   :  { %36 = vxpose.xlu0.b32.end [2/2] (short) (narrow) %v34_v1, 16  ;;  %842 = vmatpush3.bf16.msra.mxu0 %v942_v6  ;;  %v844_v40 = vpack.c.bf16 %v16_v38, %v15_v37  ;;  %v847_v42 = vpack.c.bf16 %v18_v41, %v17_v39  ;;  %v19_v56 = vld [vmem:[%s1075_s1 + $0x30] sm:$0xff]  ;;  %v20_v57 = vld [vmem:[%s1075_s1 + $0x38] sm:$0xff]  ;;  %v27_v58 = vld [vmem:[%s1075_s1 + $0x8] sm:$0x1]  ;;  %vm360_vm8 = vcmask 261120  }
   0x7   :  { %852 = vmatprep.subr.bf16.mxu0 %v902_v2  ;;  %v850_v59 = vpack.c.bf16 %v20_v57, %v19_v56  ;;  %v335_v60 = vsub.s32 0, %v985_v55  ;;  %v731_v0 = vld [vmem:[%s1075_s1 + $0x9] ss:$0 sm:$0xff]  ;;  %vm366_vm9 = vcmask 392192   ;;  %s908_s27 = smov [#allocation2]  }
   0x8   :  { %s719_s28 = sshll.u32 %s908_s27, 4  ;;  %s720_s28 = int_to_ptr.vmem [resolvable:$true] %s719_s28 }
   0x9   :  { %s878_s29 = scalar_lea.vmem %s720_s28, 128  ;;  %p883_p1 = scmp.lt.s32.totalorder %s720_s28, %s720_s28 }
   0xa   :  { %p879_p0 = scmp.ne.s32.totalorder %s720_s28, %s878_s29  ;;  %p884_p2 = scmp.lt.s32.totalorder %s878_s29, %s878_s29 }
   0xc   :  { %p885_p3 = por %p884_p2, %p883_p1 }
   0xe   :  { %p886_p4 = pnand %p885_p3, %p879_p0 }
  0x82   :  { %v51_v7 = vpop.trf.xlu0 }
  0x83   :  { %v70_v10 = vrot.slane %v51_v7, 1  ;;  %v79_v13 = vrot.slane %v51_v7, 2 }
  0x86   :  { %v52_v9 = vpop.trf.xlu0 }
  0x87   :  { %v71_v11 = vrot.slane %v52_v9, 1  ;;  %v80_v12 = vrot.slane %v52_v9, 2 }
  0x89   :  { %v76_v14 = vmax.f32 %v52_v9, %v71_v11  ;;  %v83_v15 = vsel %vm78_vm1, %v80_v12, %v82_v8  ;;  %v72_v16 = vsel %vm69_vm2, %v70_v10, %v71_v11  ;;  %v81_v19 = vsel %vm78_vm1, %v79_v13, %v80_v12 }
  0x8a   :  { %v75_v17 = vmax.f32 %v51_v7, %v72_v16 }
  0x8b   :  { %v87_v18 = vmax.f32 %v76_v14, %v83_v15  ;;  %v732_v15 = vld [vmem:[%s1075_s1 + $0xa] ss:$0 sm:$0xff] }
  0x8c   :  { %v86_v20 = vmax.f32 %v75_v17, %v81_v19 }
  0x8e   :  { %v834_v21 = vpack.c.bf16 %v87_v18, %v86_v20 }
  0x90   :  { %836 = vmatpush3.bf16.msk.msra.mxu1 %vm835_vm4, %v834_v21 }
  0x91   :  { %837 = vmatprep.subr.bf16.mxu1 %v902_v2 }
  0x93   :  { %773 = vmatmul.mubr.msk.f32.vlgmr.msra.gmra.mrb[0].mxu1 %vm88_vm5, %v12_v22 }
  0x94   :  { %839 = vmatpush3.bf16.msra.mxu1 %v942_v6  ;;  %779 = vmatprep.mubr.msk.f32.mxu1 %vm903_vm0, %v904_v3 }
  0x95   :  { %843 = vmatprep.subr.bf16.mxu1 %v902_v2 }
 0x166   :  { %v957_v23 = vpop.f32.mrb[0].mxu1 }
 0x167   :  { %v774_v24 = vpop.f32.mrb[1].mxu1  ;;  %780 = vmatmul.mubr.msk.f32.vlgmr.msra.gmra.mrb[2].mxu1 %vm165_vm6, %v957_v23 }
 0x168   :  { %801 = vmatprep.mubr.msk.f32.mxu1 %vm903_vm0, %v904_v3  ;;  %845 = vmatpush3.bf16.msra.mxu1 %v844_v40 }
 0x169   :  { %846 = vmatprep.subr.bf16.mxu1 %v902_v2 }
 0x16c   :  { %848 = vmatpush3.bf16.msra.mxu1 %v847_v42 }
 0x16d   :  { %849 = vmatprep.subr.bf16.mxu1 %v902_v2 }
 0x170   :  { %851 = vmatpush3.bf16.msra.mxu1 %v850_v59 }
 0x23a   :  { %v235_v25 = vpop.f32.mrb[2].mxu1 }
 0x23b   :  { %v239_v26 = vsel %vm165_vm6, %v235_v25, 0.0  ;;  %v781_v27 = vpop.f32.mrb[3].mxu1 }
 0x23c   :  { %v240_v28 = vrot.slane %v239_v26, 4 }
 0x23e   :  { %v241_v29 = vadd.f32 %v240_v28, %v239_v26 }
 0x240   :  { %v242_v30 = vrot.slane %v241_v29, 2 }
 0x242   :  { %v243_v31 = vadd.f32 %v242_v30, %v241_v29 }
 0x244   :  { %v244_v32 = vrot.slane %v243_v31, 1 }
 0x246   :  { %v245_v33 = vadd.f32 %v244_v32, %v243_v31  ;;  %v22_v32 = vld [vmem:[%s1075_s1 + $0x48] sm:$0xff] }
 0x248   :  { %v246_v34 = vmul.f32 0.0625, %v245_v33  ;;  %v23_v33 = vld [vmem:[%s1075_s1 + $0x50] sm:$0xff] }
 0x24a   :  { %v247_v35 = vsub.f32 %v957_v23, %v246_v34 }
 0x24c   :  { %v248_v36 = vmul.f32 %v247_v35, %v247_v35 }
 0x24e   :  { %787 = vmatmul.mubr.msk.f32.vlgmr.msra.gmra.mrb[0].mxu0 %vm165_vm6, %v248_v36 }
 0x24f   :  { %854 = vmatpush3.bf16.msra.mxu0 %v942_v6  ;;  %808 = vmatprep.mubr.msk.f32.mxu0 %vm903_vm0, %v904_v3 }
 0x250   :  { %855 = vmatprep.subr.bf16.mxu0 %v902_v2 }
 0x321   :  { %v318_v43 = vpop.f32.mrb[0].mxu0 }
 0x322   :  { %v322_v44 = vsel %vm165_vm6, %v318_v43, 0.0  ;;  %v788_v45 = vpop.f32.mrb[1].mxu0 }
 0x323   :  { %v323_v46 = vrot.slane %v322_v44, 4 }
 0x325   :  { %v324_v47 = vadd.f32 %v323_v46, %v322_v44 }
 0x327   :  { %v325_v48 = vrot.slane %v324_v47, 2 }
 0x329   :  { %v326_v49 = vadd.f32 %v325_v48, %v324_v47  ;;  %v25_v47 = vld [vmem:[%s1075_s1 + $0x60] sm:$0xff] }
 0x32b   :  { %v327_v50 = vrot.slane %v326_v49, 1 }
 0x32d   :  { %v328_v51 = vadd.f32 %v327_v50, %v326_v49  ;;  %v30_v49 = vld [vmem:[%s1075_s1 + $0xb] sm:$0x1] }
 0x32f   :  { %v329_v52 = vmul.f32 0.0625, %v328_v51 }
 0x331   :  { %v330_v53 = vadd.f32 1e-05, %v329_v52 }
 0x333   :  { %874 = vrsqrt.f32 %v330_v53  ;;  %v736_v53 = vld [vmem:[%s1075_s1 + $0xc] ss:$0 sm:$0xff] }
 0x33d   :  { %v875_v61 = vpop.eup %874 }
 0x33e   :  { %v332_v62 = vmul.f32 %v875_v61, %v27_v58 }
 0x340   :  { %v336_v63 = vrot.slane %v332_v62, %v335_v60 }
 0x342   :  { %v337_v1 = vmul.f32 %v336_v63, %v247_v35  ;;  %v24_v35 = vld [vmem:[%s1075_s1 + $0x58] sm:$0xff] }
 0x343   :  { %v862_v36 = vpack.c.bf16 %v24_v35, %v23_v33 }
 0x344   :  { %v342_v4 = vadd.f32 %v731_v0, %v337_v1  ;;  %v737_v1 = vld [vmem:[%s1075_s1 + $0xd] ss:$0 sm:$0xff] }
 0x346   :  { %v343_v5 = vmax.f32 %v342_v4, 0.0 }
 0x348   :  { %352 = vrot.lane.b32.xlu1 %v343_v5, %s906_s6  ;;  %v349_v7 = vrot.slane %v343_v5, 1  ;;  %v345_v9 = vrot.slane %v343_v5, 7 }
 0x34a   :  { %v351_v8 = vsel %vm69_vm2, %v349_v7, 0.0  ;;  %v348_v11 = vsel %vm347_vm7, 0.0, %v345_v9 }
 0x34c   :  { %356 = vrot.lane.b32.xlu1 %v351_v8, %s907_s7 }
 0x3ba   :  { %v353_v10 = vpop.permute.xlu1 %352 }
 0x3bb   :  { %v359_v12 = vsel %vm165_vm6, %v348_v11, %v353_v10 }
 0x3be   :  { %v357_v13 = vpop.permute.xlu1 %356 }
 0x3bf   :  { %v361_v14 = vsel %vm360_vm8, %v359_v12, %v357_v13 }
 0x3c0   :  { %802 = vmatmul.mubr.msk.f32.vlgmr.msra.gmra.mrb[4].mxu1 %vm366_vm9, %v361_v14 }
 0x493   :  { %v436_v16 = vpop.f32.mrb[4].mxu1 }
 0x494   :  { %v437_v17 = vadd.f32 %v732_v15, %v436_v16  ;;  %v803_v18 = vpop.f32.mrb[5].mxu1 }
 0x496   :  { %809 = vmatmul.mubr.msk.f32.vlgmr.msra.gmra.mrb[2].mxu0 %vm165_vm6, %v437_v17 }
 0x497   :  { %857 = vmatpush3.bf16.msra.mxu0 %v942_v6  ;;  %815 = vmatprep.mubr.msk.f32.mxu0 %vm903_vm0, %v904_v3  ;;  %v21_v6 = vld [vmem:[%s1075_s1 + $0x40] sm:$0xff] }
 0x498   :  { %858 = vmatprep.subr.bf16.mxu0 %v902_v2  ;;  %v859_v34 = vpack.c.bf16 %v22_v32, %v21_v6 }
 0x569   :  { %v509_v19 = vpop.f32.mrb[2].mxu0 }
 0x56a   :  { %v513_v20 = vsel %vm165_vm6, %v509_v19, 0.0  ;;  %v810_v21 = vpop.f32.mrb[3].mxu0 }
 0x56b   :  { %v514_v22 = vrot.slane %v513_v20, 4 }
 0x56d   :  { %v515_v24 = vadd.f32 %v514_v22, %v513_v20 }
 0x56f   :  { %v516_v25 = vrot.slane %v515_v24, 2 }
 0x571   :  { %v517_v26 = vadd.f32 %v516_v25, %v515_v24 }
 0x573   :  { %v518_v27 = vrot.slane %v517_v26, 1 }
 0x575   :  { %v519_v28 = vadd.f32 %v518_v27, %v517_v26 }
 0x577   :  { %v520_v29 = vmul.f32 0.0625, %v519_v28 }
 0x579   :  { %v521_v30 = vsub.f32 %v437_v17, %v520_v29 }
 0x57b   :  { %v522_v31 = vmul.f32 %v521_v30, %v521_v30 }
 0x57d   :  { %816 = vmatmul.mubr.msk.f32.vlgmr.msra.gmra.mrb[4].mxu0 %vm165_vm6, %v522_v31 }
 0x57e   :  { %830 = vmatprep.mubr.msk.f32.mxu0 %vm903_vm0, %v904_v3  ;;  %860 = vmatpush3.bf16.msra.mxu0 %v859_v34 }
 0x57f   :  { %861 = vmatprep.subr.bf16.mxu0 %v902_v2 }
 0x582   :  { %863 = vmatpush3.bf16.msra.mxu0 %v862_v36 }
 0x583   :  { %864 = vmatprep.subr.bf16.mxu0 %v902_v2  ;;  %v26_v2 = vld [vmem:[%s1075_s1 + $0x68] sm:$0xff] }
 0x584   :  { %v865_v48 = vpack.c.bf16 %v26_v2, %v25_v47 }
 0x586   :  { %866 = vmatpush3.bf16.msra.mxu0 %v865_v48 }
 0x650   :  { %v592_v3 = vpop.f32.mrb[4].mxu0 }
 0x651   :  { %v596_v37 = vsel %vm165_vm6, %v592_v3, 0.0  ;;  %v817_v38 = vpop.f32.mrb[5].mxu0 }
 0x652   :  { %v597_v39 = vrot.slane %v596_v37, 4 }
 0x654   :  { %v598_v40 = vadd.f32 %v597_v39, %v596_v37 }
 0x656   :  { %v599_v41 = vrot.slane %v598_v40, 2 }
 0x658   :  { %v600_v42 = vadd.f32 %v599_v41, %v598_v40 }
 0x65a   :  { %v601_v43 = vrot.slane %v600_v42, 1 }
 0x65c   :  { %v602_v44 = vadd.f32 %v601_v43, %v600_v42 }
 0x65e   :  { %v603_v45 = vmul.f32 0.0625, %v602_v44 }
 0x660   :  { %v604_v46 = vadd.f32 1e-05, %v603_v45 }
 0x662   :  { %876 = vrsqrt.f32 %v604_v46 }
 0x66c   :  { %v877_v50 = vpop.eup %876 }
 0x66d   :  { %v606_v51 = vmul.f32 %v877_v50, %v30_v49 }
 0x66f   :  { %v610_v52 = vrot.slane %v606_v51, %v335_v60 }
 0x671   :  { %v611_v54 = vmul.f32 %v610_v52, %v521_v30 }
 0x673   :  { %v616_v56 = vadd.f32 %v736_v53, %v611_v54 }
 0x675   :  { %v617_v57 = vmax.f32 %v616_v56, 0.0 }
 0x677   :  { %625 = vrot.lane.b32.xlu0 %v617_v57, %s906_s6  ;;  %v622_v58 = vrot.slane %v617_v57, 1  ;;  %v619_v61 = vrot.slane %v617_v57, 7 }
 0x679   :  { %v624_v59 = vsel %vm69_vm2, %v622_v58, 0.0  ;;  %v621_v63 = vsel %vm347_vm7, 0.0, %v619_v61 }
 0x67a   :  { %629 = vrot.lane.b32.xlu1 %v624_v59, %s907_s7 }
 0x6e9   :  { %v626_v62 = vpop.permute.xlu0 %625 }
 0x6ea   :  { %v632_v55 = vsel %vm165_vm6, %v621_v63, %v626_v62 }
 0x6ec   :  { %v630_v60 = vpop.permute.xlu1 %629 }
 0x6ed   :  { %v633_v0 = vsel %vm360_vm8, %v632_v55, %v630_v60 }
 0x6ee   :  { %831 = vmatmul.mubr.msk.f32.vlgmr.msra.gmra.mrb[6].mxu0 %vm366_vm9, %v633_v0 }
 0x7c1   :  { %v707_v4 = vpop.f32.mrb[6].mxu0 }
 0x7c2   :  { %v708_v5 = vadd.f32 %v737_v1, %v707_v4  ;;  %v832_v7 = vpop.f32.mrb[7].mxu0 }
 0x7c4   :  { %v711_v8 = vadd.f32 %v708_v5, %v957_v23 }
 0x7c6   :  { %712 = vst.msk [vmem:[#allocation2] sm:$0xff] %vm165_vm6, %v711_v8 }
 0x7c7   :  { %889 = shalt.err (!%p886_p4)
}
 0x7c8   :  { %s890_s1 = scalar_lea.hbm %s1076_s2, 128 }
 0x7c9   :  { %p891_p5 = scmp.ne.s32.totalorder %s1076_s2, %s890_s1  ;;  %p894_p6 = scmp.lt.u32.totalorder %s890_s1, %s1076_s2 }
 0x7cb   :  { %p896_p7 = pnand %p894_p6, %p891_p5 }
 0x7cd   :  { %899 = shalt.err (!%p896_p7)
}
 0x7ce   :  { %722 = dma.vmem_to_hbm [thread:$0]  %s720_s28, 128, %s1076_s2, [#allocation3]  }
 0x7cf   :  { %900 = dma.done.wait [#allocation3], 128  }
 0x7d0   :  { %901 = vsyncadd [#allocation3], 4294967168 }
 0x7d1   :  { %726 = vsyncpa [#allocation3], 1 }

</bundles_post_ra>
